<compile_context>
chip_gen: v7x
topology: tpu7x:2x2x1
jax: 0.10.0
libtpu: 0.0.40
codegen_flags: <defaults>
</compile_context>

<pallas_src>
import jax
import jax.numpy as jnp
from jax.experimental import pallas as pl
from jax.experimental.pallas import tpu as pltpu

_H = 128                 # padded hidden / lane width
_B1_ROW = 3 * _H         # row offsets of the small vectors inside the slab
_B2_ROW = 3 * _H + 1
_B3_ROW = 3 * _H + 2
_GAMMA_ROW = 3 * _H + 3
_BETA_ROW = 3 * _H + 4
_SLAB_ROWS = ((3 * _H + 5 + 7) // 8) * 8   # 392 (8-row aligned)


# ---------------------------------------------------------------------------
# Pallas kernel: whole MLP + LayerNorm in one VMEM-resident block.
# ---------------------------------------------------------------------------
def _modality_encoder_kernel(tok_ref, p_ref, out_ref):
    H = _H
    P = out_ref.shape[1]          # projection_dim (static, <= 128)

    tok = tok_ref[...]            # (M, 128), lane-dense, K zero-padded

    # Linear(token_dim, 64) + ReLU  (padded lanes 64:128 stay exactly 0)
    w1 = p_ref[0:H, :]            # (128, 128)
    b1 = p_ref[_B1_ROW:_B1_ROW + 1, :]
    h1 = jnp.maximum(jnp.dot(tok, w1, preferred_element_type=jnp.float32) + b1, 0.0)

    # Linear(64, 128) + ReLU        (padded K rows of w2 are 0 -> exact)
    w2 = p_ref[H:2 * H, :]
    b2 = p_ref[_B2_ROW:_B2_ROW + 1, :]
    h2 = jnp.maximum(jnp.dot(h1, w2, preferred_element_type=jnp.float32) + b2, 0.0)

    # Linear(128, projection_dim)
    w3 = p_ref[2 * H:3 * H, :P]
    b3 = p_ref[_B3_ROW:_B3_ROW + 1, :P]
    y = jnp.dot(h2, w3, preferred_element_type=jnp.float32) + b3      # (M, P)

    # LayerNorm(projection_dim), eps = 1e-5 (nn.LayerNorm default).
    # Two-pass (y - mean)^2 form for numerical stability; rsqrt goes to the
    # EUP and the lane reductions to the XLU, both off the VPU critical slot.
    gamma = p_ref[_GAMMA_ROW:_GAMMA_ROW + 1, :P]
    beta = p_ref[_BETA_ROW:_BETA_ROW + 1, :P]
    inv_n = 1.0 / P
    mean = jnp.sum(y, axis=-1, keepdims=True) * inv_n                 # (M, 1)
    d = y - mean
    var = jnp.sum(d * d, axis=-1, keepdims=True) * inv_n              # (M, 1)
    out_ref[...] = d * (gamma * jax.lax.rsqrt(var + 1e-5)) + beta


# ---------------------------------------------------------------------------
# Parameter construction (mirrors the module's __init__).
# ---------------------------------------------------------------------------
def init_params(key, token_size, token_dim, projection_dim):
    """Deterministic synthetic parameters mirroring the PyTorch module."""
    ks = jax.random.split(key, 8)

    # text/image std ~ U(0,1)*0.5 + 0.1 (scalar std, as in the module)
    text_std = jax.random.uniform(ks[0], ()) * 0.5 + 0.1
    image_std = jax.random.uniform(ks[1], ()) * 0.5 + 0.1
    text_token = jax.random.normal(ks[2], (token_size, token_dim), jnp.float32) * text_std
    image_token = jax.random.normal(ks[3], (token_size, token_dim), jnp.float32) * image_std

    def linear(k, fan_in, fan_out):
        kw, kb = jax.random.split(k)
        bound = 1.0 / jnp.sqrt(fan_in)
        w = jax.random.uniform(kw, (fan_in, fan_out), jnp.float32, -bound, bound)
        b = jax.random.uniform(kb, (1, fan_out), jnp.float32, -bound, bound)
        return w, b

    w1, b1 = linear(ks[4], token_dim, 64)
    w2, b2 = linear(ks[5], 64, 128)
    w3, b3 = linear(ks[6], 128, projection_dim)
    gamma = jnp.ones((1, projection_dim), jnp.float32)
    beta = jnp.zeros((1, projection_dim), jnp.float32)

    return dict(
        text_token=text_token, image_token=image_token,
        w1=w1, b1=b1, w2=w2, b2=b2, w3=w3, b3=b3,
        gamma=gamma, beta=beta,
    )


def pack_params(p):
    """Pack everything constant into ONE lane-dense, zero-padded VMEM slab and
    pre-pad the token buffers to 128 lanes."""
    token_dim, h1 = p["w1"].shape          # (token_dim, 64)
    h1b, h2 = p["w2"].shape                # (64, 128)
    h2b, P = p["w3"].shape                 # (128, projection_dim)
    H = _H
    assert token_dim <= H and h1 <= H and h2 <= H and P <= H
    assert h1b == h1 and h2b == h2
    token_size = p["text_token"].shape[0]

    slab = jnp.zeros((_SLAB_ROWS, H), jnp.float32)
    slab = slab.at[0:token_dim, 0:h1].set(p["w1"])      # pad lanes 64:128 = 0
    slab = slab.at[H:H + h1, 0:h2].set(p["w2"])         # pad K rows 64:128 = 0
    slab = slab.at[2 * H:2 * H + h2, 0:P].set(p["w3"])
    slab = slab.at[_B1_ROW, 0:h1].set(p["b1"][0])       # pad lanes stay 0
    slab = slab.at[_B2_ROW, 0:h2].set(p["b2"][0])
    slab = slab.at[_B3_ROW, 0:P].set(p["b3"][0])
    slab = slab.at[_GAMMA_ROW, 0:P].set(p["gamma"][0])
    slab = slab.at[_BETA_ROW, 0:P].set(p["beta"][0])

    def pad_tok(t):
        return jnp.pad(t, ((0, 0), (0, H - token_dim)))

    image_padded = pad_tok(p["image_token"])
    text_padded = pad_tok(p["text_token"])
    return dict(
        params_packed=slab,
        image_token_padded=image_padded,
        text_token_padded=text_padded,
        both_tokens_padded=jnp.concatenate([image_padded, text_padded], axis=0),
        token_size=token_size,
        projection_dim=P,
    )


# ---------------------------------------------------------------------------
# Wrappers: pallas_call glue.
# ---------------------------------------------------------------------------
def _run_kernel(tok_padded, params_packed, projection_dim):
    M = tok_padded.shape[0]
    vmem = pl.BlockSpec(memory_space=pltpu.MemorySpace.VMEM)
    return pl.pallas_call(
        _modality_encoder_kernel,
        out_shape=jax.ShapeDtypeStruct((M, projection_dim), jnp.float32),
        in_specs=[vmem, vmem],      # token, packed parameter slab
        out_specs=vmem,
    )(tok_padded, params_packed)


def modality_token_encoder(modality_type, packed):
    """Module-parity forward: one modality (modality_type is a Python str)."""
    tok = (packed["image_token_padded"] if modality_type == "image"
           else packed["text_token_padded"])
    return _run_kernel(tok, packed["params_packed"], packed["projection_dim"])


def modality_token_encoder_both(packed):
    """Both modalities in a SINGLE pallas_call (image rows first, then text)."""
    out = _run_kernel(packed["both_tokens_padded"], packed["params_packed"],
                      packed["projection_dim"])
    ts = packed["token_size"]
    return out[:ts], out[ts:]


# Pure-JAX reference (uses the raw, unpadded parameters).
def _reference(modality_type, p):
    tok = p["image_token"] if modality_type == "image" else p["text_token"]
    h = jnp.maximum(tok @ p["w1"] + p["b1"], 0.0)
    h = jnp.maximum(h @ p["w2"] + p["b2"], 0.0)
    y = h @ p["w3"] + p["b3"]
    mean = jnp.mean(y, axis=-1, keepdims=True)
    var = jnp.mean(jnp.square(y - mean), axis=-1, keepdims=True)
    return (y - mean) * jax.lax.rsqrt(var + 1e-5) * p["gamma"] + p["beta"]


if __name__ == "__main__":
    # Small, module-consistent shapes: CFG.token_size=8, CFG.token_dim=32,
    # CFG.projection_dim=128.
    token_size, token_dim, projection_dim = 8, 32, 128

    key = jax.random.PRNGKey(0)
    params = init_params(key, token_size, token_dim, projection_dim)
    packed = pack_params(params)

    # Both modalities computed with ONE pallas_call (stacked rows).
    out_img, out_txt = modality_token_encoder_both(packed)
    jax.block_until_ready(out_img)
    jax.block_until_ready(out_txt)

    ref_img = _reference("image", params)
    ref_txt = _reference("text", params)
    assert out_img.shape == (token_size, projection_dim)
    assert out_txt.shape == (token_size, projection_dim)
    assert jnp.allclose(out_img, ref_img, atol=1e-4, rtol=1e-4)
    assert jnp.allclose(out_txt, ref_txt, atol=1e-4, rtol=1e-4)

    print("KERNEL_OK")
</pallas_src>

<mosaic_0001>
module attributes {stable_mosaic.version = 11 : i64} {
  func.func @_modality_encoder_kernel(%arg0: memref<16x128xf32, #tpu.memory_space<vmem>>, %arg1: memref<392x128xf32, #tpu.memory_space<vmem>>, %arg2: memref<16x128xf32, #tpu.memory_space<vmem>>) attributes {dimension_semantics = [], scalar_prefetch = 0 : i64, scratch_operands = 0 : i64, tpu.core_type = #tpu.core_type<tc>} {
    %c0 = arith.constant 0 : index
    %c0_0 = arith.constant 0 : index
    %0 = vector.load %arg0[%c0, %c0_0] : memref<16x128xf32, #tpu.memory_space<vmem>>, vector<16x128xf32>
    %c0_1 = arith.constant 0 : index
    %c0_2 = arith.constant 0 : index
    %1 = vector.load %arg1[%c0_1, %c0_2] : memref<392x128xf32, #tpu.memory_space<vmem>>, vector<128x128xf32>
    %c384 = arith.constant 384 : index
    %c0_3 = arith.constant 0 : index
    %2 = vector.load %arg1[%c384, %c0_3] : memref<392x128xf32, #tpu.memory_space<vmem>>, vector<1x128xf32>
    %cst = arith.constant dense<0.000000e+00> : vector<16x128xf32>
    %3 = tpu.matmul %0, %1, %cst {dimension_numbers = #tpu.dot_dimension_numbers<[1], [0], [0], [1], [0, 0, 1, 1], [], []>} : vector<16x128xf32>, vector<128x128xf32>, vector<16x128xf32> -> vector<16x128xf32>
    %4 = vector.broadcast %2 : vector<1x128xf32> to vector<16x128xf32>
    %5 = arith.addf %3, %4 : vector<16x128xf32>
    %cst_4 = arith.constant 0.000000e+00 : f32
    %6 = vector.broadcast %cst_4 : f32 to vector<16x128xf32>
    %7 = arith.maximumf %5, %6 : vector<16x128xf32>
    %c128 = arith.constant 128 : index
    %c0_5 = arith.constant 0 : index
    %8 = vector.load %arg1[%c128, %c0_5] : memref<392x128xf32, #tpu.memory_space<vmem>>, vector<128x128xf32>
    %c385 = arith.constant 385 : index
    %c0_6 = arith.constant 0 : index
    %9 = vector.load %arg1[%c385, %c0_6] : memref<392x128xf32, #tpu.memory_space<vmem>>, vector<1x128xf32>
    %cst_7 = arith.constant dense<0.000000e+00> : vector<16x128xf32>
    %10 = tpu.matmul %7, %8, %cst_7 {dimension_numbers = #tpu.dot_dimension_numbers<[1], [0], [0], [1], [0, 0, 1, 1], [], []>} : vector<16x128xf32>, vector<128x128xf32>, vector<16x128xf32> -> vector<16x128xf32>
    %11 = vector.broadcast %9 : vector<1x128xf32> to vector<16x128xf32>
    %12 = arith.addf %10, %11 : vector<16x128xf32>
    %cst_8 = arith.constant 0.000000e+00 : f32
    %13 = vector.broadcast %cst_8 : f32 to vector<16x128xf32>
    %14 = arith.maximumf %12, %13 : vector<16x128xf32>
    %c256 = arith.constant 256 : index
    %c0_9 = arith.constant 0 : index
    %15 = vector.load %arg1[%c256, %c0_9] : memref<392x128xf32, #tpu.memory_space<vmem>>, vector<128x128xf32>
    %c386 = arith.constant 386 : index
    %c0_10 = arith.constant 0 : index
    %16 = vector.load %arg1[%c386, %c0_10] : memref<392x128xf32, #tpu.memory_space<vmem>>, vector<1x128xf32>
    %cst_11 = arith.constant dense<0.000000e+00> : vector<16x128xf32>
    %17 = tpu.matmul %14, %15, %cst_11 {dimension_numbers = #tpu.dot_dimension_numbers<[1], [0], [0], [1], [0, 0, 1, 1], [], []>} : vector<16x128xf32>, vector<128x128xf32>, vector<16x128xf32> -> vector<16x128xf32>
    %18 = vector.broadcast %16 : vector<1x128xf32> to vector<16x128xf32>
    %19 = arith.addf %17, %18 : vector<16x128xf32>
    %c387 = arith.constant 387 : index
    %c0_12 = arith.constant 0 : index
    %20 = vector.load %arg1[%c387, %c0_12] : memref<392x128xf32, #tpu.memory_space<vmem>>, vector<1x128xf32>
    %c388 = arith.constant 388 : index
    %c0_13 = arith.constant 0 : index
    %21 = vector.load %arg1[%c388, %c0_13] : memref<392x128xf32, #tpu.memory_space<vmem>>, vector<1x128xf32>
    %cst_14 = arith.constant dense<0.000000e+00> : vector<16xf32>
    %22 = vector.multi_reduction <add>, %19, %cst_14 [1] : vector<16x128xf32> to vector<16xf32>
    %23 = vector.shape_cast %22 : vector<16xf32> to vector<16x1xf32>
    %cst_15 = arith.constant 7.812500e-03 : f32
    %24 = vector.broadcast %cst_15 : f32 to vector<16x1xf32>
    %25 = arith.mulf %23, %24 : vector<16x1xf32>
    %26 = vector.broadcast %25 : vector<16x1xf32> to vector<16x128xf32>
    %27 = arith.subf %19, %26 : vector<16x128xf32>
    %28 = arith.mulf %27, %27 : vector<16x128xf32>
    %cst_16 = arith.constant dense<0.000000e+00> : vector<16xf32>
    %29 = vector.multi_reduction <add>, %28, %cst_16 [1] : vector<16x128xf32> to vector<16xf32>
    %30 = vector.shape_cast %29 : vector<16xf32> to vector<16x1xf32>
    %cst_17 = arith.constant 7.812500e-03 : f32
    %31 = vector.broadcast %cst_17 : f32 to vector<16x1xf32>
    %32 = arith.mulf %30, %31 : vector<16x1xf32>
    %cst_18 = arith.constant 9.99999974E-6 : f32
    %33 = vector.broadcast %cst_18 : f32 to vector<16x1xf32>
    %34 = arith.addf %32, %33 : vector<16x1xf32>
    %35 = math.rsqrt %34 : vector<16x1xf32>
    %36 = vector.broadcast %20 : vector<1x128xf32> to vector<16x128xf32>
    %37 = vector.broadcast %35 : vector<16x1xf32> to vector<16x128xf32>
    %38 = arith.mulf %36, %37 : vector<16x128xf32>
    %39 = arith.mulf %27, %38 : vector<16x128xf32>
    %40 = vector.broadcast %21 : vector<1x128xf32> to vector<16x128xf32>
    %41 = arith.addf %39, %40 : vector<16x128xf32>
    %c0_19 = arith.constant 0 : index
    %c0_20 = arith.constant 0 : index
    %42 = vector.load %arg2[%c0_19, %c0_20] : memref<16x128xf32, #tpu.memory_space<vmem>>, vector<16x128xf32>
    tpu.vector_store %arg2[%c0_19, %c0_20], %41 {strides = array<i32>} : memref<16x128xf32, #tpu.memory_space<vmem>>, vector<16x128xf32>,
    return
  }
}

</mosaic_0001>

<bundles_post_ra>
// kernel: tpu_custom_call.1
= control target key start
LH: loop header
LB: loop body
LE: loop exit
PB: predicated region body
PF: predicated region fallthrough
CT: control target
= control target key end

     0   :  { %7 = vsyncpa [#allocation3], 0  ;;  %s796_s0 = inlined_call_operand.hbm [shape: f32[16,128], index: 0, kind: input, shape index: {}]   ;;  %s797_s1 = inlined_call_operand.hbm [shape: f32[392,128], index: 1, kind: input, shape index: {}]   ;;  %s798_s2 = inlined_call_operand.hbm [shape: f32[16,128], index: 2, kind: output, shape index: {}]  }
   0x1   :  { %8 = vsyncpa [#allocation6], 0 }
   0x2   :  { %9 = vsyncpa [#allocation4], 0  ;;  %s731_s9 = smov [#allocation2]   ;;  %s659_s13 = scalar_lea.hbm %s796_s0, 256 }
   0x3   :  { %s15_s10 = sshll.u32 %s731_s9, 4  ;;  %p660_p0 = scmp.ne.s32.totalorder %s796_s0, %s659_s13  ;;  %s16_s10 = int_to_ptr.vmem [resolvable:$true] %s15_s10 }
   0x4   :  { %p663_p1 = scmp.lt.u32.totalorder %s659_s13, %s796_s0 }
   0x6   :  { %p665_p2 = pnand %p663_p1, %p660_p0 }
   0x8   :  { %668 = shalt.err (!%p665_p2)
}
   0x9   :  { %s669_s18 = scalar_lea.vmem %s16_s10, 256  ;;  %p674_p4 = scmp.lt.s32.totalorder %s16_s10, %s16_s10 }
   0xa   :  { %p670_p3 = scmp.ne.s32.totalorder %s16_s10, %s669_s18  ;;  %p675_p5 = scmp.lt.s32.totalorder %s669_s18, %s669_s18 }
   0xc   :  { %p676_p6 = por %p675_p5, %p674_p4 }
   0xe   :  { %p677_p7 = pnand %p676_p6, %p670_p3 }
  0x10   :  { %680 = shalt.err (!%p677_p7)
}
  0x11   :  { %s732_s19 = smov 128   ;;  %s733_s20 = smov 8  }
  0x12   :  { %21 = dma.hbm_to_vmem [thread:$0]  %s796_s0, 256, %s16_s10, [#allocation3], %s732_s19, %s732_s19, %s733_s20  }
  0x13   :  { %s734_s23 = smov [#allocation5]   ;;  %s681_s27 = scalar_lea.hbm %s797_s1, 6272 }
  0x14   :  { %s27_s24 = sshll.u32 %s734_s23, 4  ;;  %p682_p8 = scmp.ne.s32.totalorder %s797_s1, %s681_s27  ;;  %s28_s24 = int_to_ptr.vmem [resolvable:$true] %s27_s24 }
  0x15   :  { %p685_p9 = scmp.lt.u32.totalorder %s681_s27, %s797_s1 }
  0x17   :  { %p687_p10 = pnand %p685_p9, %p682_p8 }
  0x19   :  { %690 = shalt.err (!%p687_p10)
}
  0x1a   :  { %s691_s4 = scalar_lea.vmem %s28_s24, 6272  ;;  %p696_p12 = scmp.lt.s32.totalorder %s28_s24, %s28_s24 }
  0x1b   :  { %p692_p11 = scmp.ne.s32.totalorder %s28_s24, %s691_s4  ;;  %p697_p13 = scmp.lt.s32.totalorder %s691_s4, %s691_s4 }
  0x1d   :  { %p698_p0 = por %p697_p13, %p696_p12 }
  0x1f   :  { %p699_p1 = pnand %p698_p0, %p692_p11 }
  0x21   :  { %702 = shalt.err (!%p699_p1)
}
  0x22   :  { %33 = dma.hbm_to_vmem [thread:$0]  %s797_s1, 6272, %s28_s24, [#allocation6], %s732_s19, %s732_s19, %s733_s20  }
  0x23   :  { %725 = dma.done.wait [#allocation3], 256  }
  0x24   :  { %726 = vsyncadd [#allocation3], 4294967040 }
  0x25   :  { %727 = dma.done.wait [#allocation6], 6272  }
  0x26   :  { %728 = vsyncadd [#allocation6], 4294961024  ;;  %v42_v0 = vld [vmem:[#allocation5] sm:$0xff]  ;;  %v43_v1 = vld [vmem:[#allocation5 + $0x8] sm:$0xff]  ;;  %s735_s1 = smov [#allocation7]  }
  0x27   :  { %v44_v2 = vld [vmem:[#allocation5 + $0x10] sm:$0xff]  ;;  %v554_v3 = vpack.c.bf16 %v43_v1, %v42_v0  ;;  %v45_v4 = vld [vmem:[#allocation5 + $0x18] sm:$0xff]  ;;  %v46_v6 = vld [vmem:[#allocation5 + $0x20] sm:$0xff]  ;;  %s377_s6 = sshll.u32 %s735_s1, 4  ;;  %s378_s6 = int_to_ptr.vmem [resolvable:$true] %s377_s6 }
  0x28   :  { %v558_v5 = vpack.c.bf16 %v45_v4, %v44_v2  ;;  %v47_v7 = vld [vmem:[#allocation5 + $0x28] sm:$0xff]  ;;  %v48_v9 = vld [vmem:[#allocation5 + $0x30] sm:$0xff]  ;;  %v49_v10 = vld [vmem:[#allocation5 + $0x38] sm:$0xff]  ;;  %s703_s7 = scalar_lea.vmem %s378_s6, 256  ;;  %p708_p3 = scmp.lt.s32.totalorder %s378_s6, %s378_s6 }
  0x29   :  { %555 = vmatprep.subr.bf16.mxu0 %v554_v3  ;;  %v562_v8 = vpack.c.bf16 %v47_v7, %v46_v6  ;;  %v40_v11 = vld [vmem:[#allocation2] sm:$0xff]  ;;  %v140_v12 = vld [vmem:[#allocation5 + $0x80] sm:$0xff]  ;;  %v141_v13 = vld [vmem:[#allocation5 + $0x88] sm:$0xff]  ;;  %v566_v20 = vpack.c.bf16 %v49_v10, %v48_v9  ;;  %p704_p2 = scmp.ne.s32.totalorder %s378_s6, %s703_s7  ;;  %p709_p4 = scmp.lt.s32.totalorder %s703_s7, %s703_s7 }
  0x2a   :  { %557 = vmatpush3.bf16.msra.mxu0 %v554_v3  ;;  %481 = vmatprep.mubr.f32.mxu0 %v40_v11  ;;  %v142_v14 = vld [vmem:[#allocation5 + $0x90] sm:$0xff]  ;;  %v586_v15 = vpack.c.bf16 %v141_v13, %v140_v12  ;;  %v143_v16 = vld [vmem:[#allocation5 + $0x98] sm:$0xff]  ;;  %v144_v18 = vld [vmem:[#allocation5 + $0xa0] sm:$0xff] }
  0x2b   :  { %559 = vmatprep.subr.bf16.mxu0 %v558_v5  ;;  %v590_v17 = vpack.c.bf16 %v143_v16, %v142_v14  ;;  %v145_v19 = vld [vmem:[#allocation5 + $0xa8] sm:$0xff]  ;;  %v50_v21 = vld [vmem:[#allocation5 + $0x40] sm:$0xff]  ;;  %v146_v24 = vld [vmem:[#allocation5 + $0xb0] sm:$0xff]  ;;  %p710_p5 = por %p709_p4, %p708_p3 }
  0x2c   :  { %587 = vmatprep.subr.bf16.mxu1 %v586_v15  ;;  %v51_v22 = vld [vmem:[#allocation5 + $0x48] sm:$0xff]  ;;  %v594_v23 = vpack.c.bf16 %v145_v19, %v144_v18  ;;  %v147_v25 = vld [vmem:[#allocation5 + $0xb8] sm:$0xff]  ;;  %v52_v27 = vld [vmem:[#allocation5 + $0x50] sm:$0xff] }
  0x2d   :  { %589 = vmatpush3.bf16.msra.mxu1 %v586_v15  ;;  %v570_v26 = vpack.c.bf16 %v51_v22, %v50_v21  ;;  %v53_v28 = vld [vmem:[#allocation5 + $0x58] sm:$0xff]  ;;  %v598_v29 = vpack.c.bf16 %v147_v25, %v146_v24  ;;  %v148_v30 = vld [vmem:[#allocation5 + $0xc0] sm:$0xff]  ;;  %v149_v31 = vld [vmem:[#allocation5 + $0xc8] sm:$0xff]  ;;  %p711_p6 = pnand %p710_p5, %p704_p2 }
  0x2e   :  { %561 = vmatpush3.bf16.msra.mxu0 %v558_v5  ;;  %591 = vmatprep.subr.bf16.mxu1 %v590_v17  ;;  %v574_v32 = vpack.c.bf16 %v53_v28, %v52_v27  ;;  %v54_v33 = vld [vmem:[#allocation5 + $0x60] sm:$0xff]  ;;  %v55_v34 = vld [vmem:[#allocation5 + $0x68] sm:$0xff]  ;;  %v602_v35 = vpack.c.bf16 %v149_v31, %v148_v30  ;;  %v150_v36 = vld [vmem:[#allocation5 + $0xd0] sm:$0xff] }
  0x2f   :  { %563 = vmatprep.subr.bf16.mxu0 %v562_v8  ;;  %v151_v37 = vld [vmem:[#allocation5 + $0xd8] sm:$0xff]  ;;  %v578_v38 = vpack.c.bf16 %v55_v34, %v54_v33  ;;  %v56_v39 = vld [vmem:[#allocation5 + $0x70] sm:$0xff]  ;;  %v152_v42 = vld [vmem:[#allocation5 + $0xe0] sm:$0xff] }
  0x30   :  { %v57_v40 = vld [vmem:[#allocation5 + $0x78] sm:$0xff]  ;;  %v606_v41 = vpack.c.bf16 %v151_v37, %v150_v36  ;;  %v153_v43 = vld [vmem:[#allocation5 + $0xe8] sm:$0xff]  ;;  %v154_v47 = vld [vmem:[#allocation5 + $0xf0] sm:$0xff] }
  0x31   :  { %593 = vmatpush3.bf16.msra.mxu1 %v590_v17  ;;  %v582_v44 = vpack.c.bf16 %v57_v40, %v56_v39  ;;  %v610_v45 = vpack.c.bf16 %v153_v43, %v152_v42  ;;  %v41_v46 = vld [vmem:[#allocation2 + $0x8] sm:$0xff]  ;;  %v238_v50 = vld [vmem:[#allocation5 + $0x100] sm:$0xff]  ;;  %v239_v51 = vld [vmem:[#allocation5 + $0x108] sm:$0xff] }
  0x32   :  { %565 = vmatpush3.bf16.msra.mxu0 %v562_v8  ;;  %595 = vmatprep.subr.bf16.mxu1 %v594_v23  ;;  %v155_v48 = vld [vmem:[#allocation5 + $0xf8] sm:$0xff]  ;;  %v240_v52 = vld [vmem:[#allocation5 + $0x110] sm:$0xff]  ;;  %v618_v53 = vpack.c.bf16 %v239_v51, %v238_v50  ;;  %v242_v56 = vld [vmem:[#allocation5 + $0x120] sm:$0xff] }
  0x33   :  { %567 = vmatprep.subr.bf16.mxu0 %v566_v20  ;;  %v614_v49 = vpack.c.bf16 %v155_v48, %v154_v47  ;;  %v241_v54 = vld [vmem:[#allocation5 + $0x118] sm:$0xff]  ;;  %v243_v57 = vld [vmem:[#allocation5 + $0x128] sm:$0xff]  ;;  %v244_v59 = vld [vmem:[#allocation5 + $0x130] sm:$0xff] }
  0x34   :  { %v622_v55 = vpack.c.bf16 %v241_v54, %v240_v52  ;;  %v626_v58 = vpack.c.bf16 %v243_v57, %v242_v56  ;;  %v245_v60 = vld [vmem:[#allocation5 + $0x138] sm:$0xff]  ;;  %v246_v62 = vld [vmem:[#allocation5 + $0x140] sm:$0xff]  ;;  %v247_v63 = vld [vmem:[#allocation5 + $0x148] sm:$0xff] }
  0x35   :  { %597 = vmatpush3.bf16.msra.mxu1 %v594_v23  ;;  %v630_v61 = vpack.c.bf16 %v245_v60, %v244_v59  ;;  %v634_v0 = vpack.c.bf16 %v247_v63, %v246_v62  ;;  %v248_v1 = vld [vmem:[#allocation5 + $0x150] sm:$0xff]  ;;  %v249_v2 = vld [vmem:[#allocation5 + $0x158] sm:$0xff]  ;;  %v250_v4 = vld [vmem:[#allocation5 + $0x160] sm:$0xff] }
  0x36   :  { %569 = vmatpush3.bf16.msra.mxu0 %v566_v20  ;;  %599 = vmatprep.subr.bf16.mxu1 %v598_v29  ;;  %v638_v3 = vpack.c.bf16 %v249_v2, %v248_v1  ;;  %v251_v5 = vld [vmem:[#allocation5 + $0x168] sm:$0xff]  ;;  %v390_v7 = vld [vmem:[#allocation5 + $0x180] ss:$0 sm:$0xff]  ;;  %v252_v14 = vld [vmem:[#allocation5 + $0x170] sm:$0xff] }
  0x37   :  { %571 = vmatprep.subr.bf16.mxu0 %v570_v26  ;;  %v642_v6 = vpack.c.bf16 %v251_v5, %v250_v4  ;;  %v253_v15 = vld [vmem:[#allocation5 + $0x178] sm:$0xff]  ;;  %v391_v17 = vld [vmem:[#allocation5 + $0x181] ss:$0 sm:$0xff]  ;;  %v392_v24 = vld [vmem:[#allocation5 + $0x182] ss:$0 sm:$0xff] }
  0x38   :  { %v646_v16 = vpack.c.bf16 %v253_v15, %v252_v14  ;;  %v393_v43 = vld [vmem:[#allocation5 + $0x183] ss:$0 sm:$0xff] }
  0x39   :  { %601 = vmatpush3.bf16.msra.mxu1 %v598_v29 }
  0x3a   :  { %573 = vmatpush3.bf16.msra.mxu0 %v570_v26  ;;  %603 = vmatprep.subr.bf16.mxu1 %v602_v35 }
  0x3b   :  { %575 = vmatprep.subr.bf16.mxu0 %v574_v32 }
  0x3d   :  { %605 = vmatpush3.bf16.msra.mxu1 %v602_v35 }
  0x3e   :  { %577 = vmatpush3.bf16.msra.mxu0 %v574_v32  ;;  %607 = vmatprep.subr.bf16.mxu1 %v606_v41 }
  0x3f   :  { %579 = vmatprep.subr.bf16.mxu0 %v578_v38 }
  0x41   :  { %609 = vmatpush3.bf16.msra.mxu1 %v606_v41 }
  0x42   :  { %581 = vmatpush3.bf16.msra.mxu0 %v578_v38  ;;  %611 = vmatprep.subr.bf16.mxu1 %v610_v45 }
  0x43   :  { %583 = vmatprep.subr.bf16.mxu0 %v582_v44 }
  0x45   :  { %613 = vmatpush3.bf16.msra.mxu1 %v610_v45 }
  0x46   :  { %585 = vmatpush3.bf16.msra.mxu0 %v582_v44  ;;  %615 = vmatprep.subr.bf16.mxu1 %v614_v49 }
  0x47   :  { %619 = vmatprep.subr.bf16.mxu0 %v618_v53 }
  0x49   :  { %482 = vmatmul.mubr.f32.vlgmr.msra.gmra.mrb[0].mxu0 %v41_v46  ;;  %617 = vmatpush3.bf16.msra.mxu1 %v614_v49  ;;  %v394_v46 = vld [vmem:[#allocation5 + $0x184] ss:$0 sm:$0xff] }
  0x4a   :  { %621 = vmatpush3.bf16.msra.mxu0 %v618_v53 }
  0x4b   :  { %623 = vmatprep.subr.bf16.mxu0 %v622_v55 }
  0x4e   :  { %625 = vmatpush3.bf16.msra.mxu0 %v622_v55 }
  0x4f   :  { %627 = vmatprep.subr.bf16.mxu0 %v626_v58 }
  0x52   :  { %629 = vmatpush3.bf16.msra.mxu0 %v626_v58 }
  0x53   :  { %631 = vmatprep.subr.bf16.mxu0 %v630_v61 }
  0x56   :  { %633 = vmatpush3.bf16.msra.mxu0 %v630_v61 }
  0x57   :  { %635 = vmatprep.subr.bf16.mxu0 %v634_v0 }
  0x5a   :  { %637 = vmatpush3.bf16.msra.mxu0 %v634_v0 }
  0x5b   :  { %639 = vmatprep.subr.bf16.mxu0 %v638_v3 }
  0x5e   :  { %641 = vmatpush3.bf16.msra.mxu0 %v638_v3 }
  0x5f   :  { %643 = vmatprep.subr.bf16.mxu0 %v642_v6 }
  0x62   :  { %645 = vmatpush3.bf16.msra.mxu0 %v642_v6 }
  0x63   :  { %647 = vmatprep.subr.bf16.mxu0 %v646_v16 }
  0x66   :  { %649 = vmatpush3.bf16.msra.mxu0 %v646_v16 }
 0x11c   :  { %v483_v8 = vpop.f32.mrb[0].mxu0 }
 0x11d   :  { %v135_v9 = vadd.f32 %v483_v8, %v390_v7  ;;  %v129_v10 = vpop.f32.mrb[1].mxu0 }
 0x11e   :  { %v130_v11 = vadd.f32 %v390_v7, %v129_v10 }
 0x11f   :  { %v139_v13 = vmax.f32 %v135_v9, 0.0 }
 0x120   :  { %v138_v12 = vmax.f32 %v130_v11, 0.0 }
 0x122   :  { %516 = vmatprep.mubr.f32.mxu1 %v138_v12 }
 0x123   :  { %517 = vmatmul.mubr.f32.vlgmr.msra.gmra.mrb[0].mxu1 %v139_v13 }
 0x1f6   :  { %v518_v18 = vpop.f32.mrb[0].mxu1 }
 0x1f7   :  { %v233_v19 = vadd.f32 %v518_v18, %v391_v17  ;;  %v227_v20 = vpop.f32.mrb[1].mxu1 }
 0x1f8   :  { %v228_v21 = vadd.f32 %v391_v17, %v227_v20 }
 0x1f9   :  { %v237_v23 = vmax.f32 %v233_v19, 0.0 }
 0x1fa   :  { %v236_v22 = vmax.f32 %v228_v21, 0.0 }
 0x1fc   :  { %551 = vmatprep.mubr.f32.mxu0 %v236_v22 }
 0x1fd   :  { %552 = vmatmul.mubr.f32.vlgmr.msra.gmra.mrb[2].mxu0 %v237_v23 }
 0x2d0   :  { %v553_v25 = vpop.f32.mrb[2].mxu0 }
 0x2d1   :  { %v325_v26 = vpop.f32.mrb[3].mxu0  ;;  %v331_v28 = vadd.f32 %v553_v25, %v392_v24 }
 0x2d2   :  { %v326_v27 = vadd.f32 %v392_v24, %v325_v26 }
 0x2d4   :  { %336 = vadd.xlane.f32.xlu0 %v326_v27 }
 0x2d8   :  { %338 = vadd.xlane.f32.xlu0 %v331_v28 }
 0x361   :  { %v337_v29 = vpop.xlane.xlu0 %336 }
 0x362   :  { %v340_v30 = vmul.f32 0.0078125, %v337_v29 }
 0x364   :  { %v342_v31 = vsub.f32 %v326_v27, %v340_v30 }
 0x365   :  { %v339_v32 = vpop.xlane.xlu0 %338 }
 0x366   :  { %v341_v33 = vmul.f32 0.0078125, %v339_v32  ;;  %v344_v34 = vmul.f32 %v342_v31, %v342_v31 }
 0x368   :  { %v343_v35 = vsub.f32 %v331_v28, %v341_v33  ;;  %346 = vadd.xlane.f32.xlu1 %v344_v34 }
 0x36a   :  { %v345_v36 = vmul.f32 %v343_v35, %v343_v35 }
 0x36c   :  { %348 = vadd.xlane.f32.xlu1 %v345_v36 }
 0x3f5   :  { %v347_v37 = vpop.xlane.xlu1 %346 }
 0x3f6   :  { %v350_v38 = vmul.f32 0.0078125, %v347_v37 }
 0x3f8   :  { %v352_v39 = vadd.f32 1e-05, %v350_v38 }
 0x3f9   :  { %v349_v40 = vpop.xlane.xlu1 %348 }
 0x3fa   :  { %655 = vrsqrt.f32 %v352_v39  ;;  %v351_v41 = vmul.f32 0.0078125, %v349_v40 }
 0x3fc   :  { %v353_v42 = vadd.f32 1e-05, %v351_v41 }
 0x3fe   :  { %657 = vrsqrt.f32 %v353_v42 }
 0x404   :  { %v656_v44 = vpop.eup %655 }
 0x405   :  { %v360_v45 = vmul.f32 %v656_v44, %v393_v43 }
 0x407   :  { %v362_v47 = vmul.f32 %v360_v45, %v342_v31 }
 0x408   :  { %v658_v48 = vpop.eup %657 }
 0x409   :  { %v361_v49 = vmul.f32 %v658_v48, %v393_v43  ;;  %v368_v50 = vadd.f32 %v394_v46, %v362_v47 }
 0x40b   :  { %v363_v51 = vmul.f32 %v361_v49, %v343_v35  ;;  %370 = vst [vmem:[#allocation7] sm:$0xff] %v368_v50 }
 0x40d   :  { %v369_v52 = vadd.f32 %v394_v46, %v363_v51 }
 0x40f   :  { %371 = vst [vmem:[#allocation7 + $0x8] sm:$0xff] %v369_v52 }
 0x410   :  { %714 = shalt.err (!%p711_p6)
}
 0x411   :  { %s715_s10 = scalar_lea.hbm %s798_s2, 256 }
 0x412   :  { %p716_p7 = scmp.ne.s32.totalorder %s798_s2, %s715_s10  ;;  %p719_p8 = scmp.lt.u32.totalorder %s715_s10, %s798_s2 }
 0x414   :  { %p721_p9 = pnand %p719_p8, %p716_p7 }
 0x416   :  { %724 = shalt.err (!%p721_p9)
}
 0x417   :  { %383 = dma.vmem_to_hbm [thread:$0]  %s378_s6, 256, %s798_s2, [#allocation4], %s732_s19, %s732_s19, %s733_s20  }
 0x418   :  { %729 = dma.done.wait [#allocation4], 256  }
 0x419   :  { %730 = vsyncadd [#allocation4], 4294967040 }
 0x41a   :  { %387 = vsyncpa [#allocation3], 1 }
 0x41b   :  { %388 = vsyncpa [#allocation6], 1 }
 0x41c   :  { %389 = vsyncpa [#allocation4], 1 }

</bundles_post_ra>
